<compile_context>
chip_gen: v5e
topology: v5e:2x2
jax: 0.10.0
libtpu: 0.0.40
codegen_flags: <defaults>
</compile_context>

<pallas_src>
import functools

import jax
import jax.numpy as jnp
from jax.experimental import pallas as pl
from jax.experimental.pallas import tpu as pltpu


def _ffn_kernel(x_ref, w13_ref, w2_ref, o_ref, acc_ref, *, th):
    """One (M-tile, H-tile) grid step.

    x_ref   : (tm, D)      activation tile (block index constant over j -> resident)
    w13_ref : (2*th, D)    stacked [w1_tile_j ; w3_tile_j], torch [out, in] layout
    w2_ref  : (D, th)      w2 tile, torch [out, in] layout
    o_ref   : (tm, D)      output tile, written once at the last H step
    acc_ref : (tm, D) f32  VMEM accumulator carried across the H (reduction) axis
    """
    j = pl.program_id(1)
    nj = pl.num_programs(1)

    x = x_ref[...]                                   # (tm, D), caller dtype (bf16 demo)
    # Contract the LAST axis of both operands (torch [out, in] weight layout).
    # TODO(synk): confirm with pl.lower_as_mlir that no in-loop vxpose is emitted;
    # if any shows up, pre-transpose the weights once at model-load time instead.
    dn = (((1,), (1,)), ((), ()))

    # Fused w1/w3 projection: one MXU pass producing (tm, 2*th) in f32.
    h13 = jax.lax.dot_general(x, w13_ref[...], dn,
                              preferred_element_type=jnp.float32)
    h1 = h13[:, :th]                                 # th is 128-aligned -> free slices
    h3 = h13[:, th:]
    # SiLU + gate in f32 (sigmoid -> EUP), single cast back for the MXU.
    h = ((h1 * jax.nn.sigmoid(h1)) * h3).astype(x.dtype)

    # Second projection partial sum over this H slice: (tm, th) x (D, th)^T -> (tm, D).
    part = jax.lax.dot_general(h, w2_ref[...], dn,
                               preferred_element_type=jnp.float32)

    @pl.when(j == 0)
    def _():
        acc_ref[...] = part                          # first step: store, no zero-fill

    @pl.when(j > 0)
    def _():
        acc_ref[...] += part

    @pl.when(j == nj - 1)
    def _():
        o_ref[...] = acc_ref[...].astype(o_ref.dtype)


def _round_up(x, m):
    return ((x + m - 1) // m) * m


def _default_config():
    """(tm_target, th_target, vmem_limit_bytes, min_m_tiles) per TPU generation."""
    try:
        kind = jax.devices()[0].device_kind.lower()
    except Exception:  # pragma: no cover - defensive
        kind = ""
    if "v5 lite" in kind or "v5e" in kind or "v5lite" in kind:
        # v5e: ~197 TF/s vs ~0.82 TB/s -> needs ~240 flops/B; 128 MiB physical VMEM.
        return 512, 512, 96 * 2**20, 1
    if "v6" in kind or "trillium" in kind:
        # v6e: ~918 TF/s vs ~1.4 TB/s -> needs ~650 flops/B; 128 MiB physical VMEM.
        return 1024, 512, 100 * 2**20, 1
    # v7x (64 MiB physical VMEM, ~3.2 TB/s/TC, 2 TCs) and unknown chips:
    # footprint ~= 12*D*(tm+th) -> ~36 MiB at D=4096, safely under 64 MiB.
    return 512, 256, 56 * 2**20, 2


def _pick_m_tile(m, target, min_tiles):
    """tm (multiple of 16 for packed bf16 sublanes) and the padded M it tiles."""
    tm = max(16, min(_round_up(target, 16), _round_up(m, 16)))
    # Megacore: keep >= min_tiles M-tiles so a multi-TC chip can split the
    # 'parallel' axis across cores.
    if min_tiles > 1 and m > 16 * min_tiles:
        tm = min(tm, _round_up(-(-m // min_tiles), 16))
    return tm, _round_up(m, tm)


def _pick_hidden_tile(h, target):
    """th (multiple of 128, <= target) and the padded H it tiles exactly."""
    cap = max(128, (target // 128) * 128)
    if h <= cap:
        th = _round_up(h, 128)
        return th, th
    for t in range(cap, 0, -128):
        if h % t == 0:
            return t, h
    return cap, _round_up(h, cap)


def feed_forward(x, w1, w2, w3, *, tm_target=None, th_target=None,
                 vmem_limit_bytes=None):
    """SwiGLU FFN.  x: [..., D]; w1, w3: [H, D]; w2: [D, H] (torch layouts)."""
    orig_shape = x.shape
    D = orig_shape[-1]
    H = w1.shape[0]
    assert w1.shape == (H, D) and w3.shape == (H, D) and w2.shape == (D, H)

    d_tm, d_th, d_vmem, min_m_tiles = _default_config()
    tm_target = d_tm if tm_target is None else tm_target
    th_target = d_th if th_target is None else th_target
    vmem_limit_bytes = d_vmem if vmem_limit_bytes is None else vmem_limit_bytes

    x2d = x.reshape(-1, D)
    M = x2d.shape[0]

    tm, M_pad = _pick_m_tile(M, tm_target, min_m_tiles)
    th, H_pad = _pick_hidden_tile(H, th_target)
    grid = (M_pad // tm, H_pad // th)

    if M_pad != M:
        x2d = jnp.pad(x2d, ((0, M_pad - M), (0, 0)))
    # Zero-padded hidden rows gate to zero (silu(0)*0 = 0) and the matching w2
    # columns are zero, so H padding does not change the result.
    w1p = jnp.pad(w1, ((0, H_pad - H), (0, 0))) if H_pad != H else w1
    w3p = jnp.pad(w3, ((0, H_pad - H), (0, 0))) if H_pad != H else w3
    w2p = jnp.pad(w2, ((0, 0), (0, H_pad - H))) if H_pad != H else w2

    # Pack w1/w3 per H-tile: block j of the (2*H_pad, D) array is
    # [w1_tile_j ; w3_tile_j] -> one weight DMA stream + one MXU pass per step.
    # (In a real model this repack happens once at weight-load time.)
    nh = H_pad // th
    w13 = jnp.concatenate(
        [w1p.reshape(nh, th, D), w3p.reshape(nh, th, D)], axis=1
    ).reshape(2 * H_pad, D)

    # Advisory cost estimate; weights are re-streamed once per M tile.
    flops = 6 * M_pad * D * H_pad
    bytes_accessed = (
        2 * M_pad * D * x2d.dtype.itemsize                      # x in + y out
        + grid[0] * (w13.size + w2p.size) * w1.dtype.itemsize   # streamed weights
    )

    out = pl.pallas_call(
        functools.partial(_ffn_kernel, th=th),
        out_shape=jax.ShapeDtypeStruct((M_pad, D), x.dtype),
        grid_spec=pltpu.PrefetchScalarGridSpec(
            num_scalar_prefetch=0,
            grid=grid,
            in_specs=[
                pl.BlockSpec((tm, D), lambda i, j: (i, 0)),       # x tile (resident over j)
                pl.BlockSpec((2 * th, D), lambda i, j: (j, 0)),   # [w1;w3] tile
                pl.BlockSpec((D, th), lambda i, j: (0, j)),       # w2 tile
            ],
            out_specs=pl.BlockSpec((tm, D), lambda i, j: (i, 0)),
            scratch_shapes=[pltpu.VMEM((tm, D), jnp.float32)],
        ),
        compiler_params=pltpu.CompilerParams(
            dimension_semantics=("parallel", "arbitrary"),
            vmem_limit_bytes=vmem_limit_bytes,
        ),
        cost_estimate=pl.CostEstimate(
            flops=flops, transcendentals=M_pad * H_pad,
            bytes_accessed=bytes_accessed),
    )(x2d, w13, w2p)

    if M_pad != M:
        out = out[:M]
    return out.reshape(*orig_shape[:-1], D)


def feed_forward_ref(x, w1, w2, w3):
    """Pure-JAX reference matching the PyTorch module (same dtype handling)."""
    h1 = jnp.einsum("...d,hd->...h", x, w1, preferred_element_type=jnp.float32)
    h3 = jnp.einsum("...d,hd->...h", x, w3, preferred_element_type=jnp.float32)
    h = ((h1 * jax.nn.sigmoid(h1)) * h3).astype(x.dtype)
    y = jnp.einsum("...h,dh->...d", h, w2, preferred_element_type=jnp.float32)
    return y.astype(x.dtype)


if __name__ == "__main__":
    # Module config: FeedForward(dim=128, hidden_dim=384, multiple_of=128)
    #   -> hidden = int(2*384/3) = 256, rounded up to multiple_of=128 -> 256.
    batch, seq, dim = 2, 64, 128
    hidden_dim, multiple_of = 384, 128
    hidden = int(2 * hidden_dim / 3)
    hidden = multiple_of * ((hidden + multiple_of - 1) // multiple_of)   # 256

    key = jax.random.PRNGKey(0)
    k_x, k_w1, k_w2, k_w3 = jax.random.split(key, 4)

    # bf16 activations/weights (native MXU mode with f32 accumulation).
    x = jax.random.normal(k_x, (batch, seq, dim), dtype=jnp.float32).astype(jnp.bfloat16)
    b1 = 1.0 / (dim ** 0.5)
    b2 = 1.0 / (hidden ** 0.5)
    w1 = jax.random.uniform(k_w1, (hidden, dim), jnp.float32, -b1, b1).astype(jnp.bfloat16)
    w3 = jax.random.uniform(k_w3, (hidden, dim), jnp.float32, -b1, b1).astype(jnp.bfloat16)
    w2 = jax.random.uniform(k_w2, (dim, hidden), jnp.float32, -b2, b2).astype(jnp.bfloat16)

    # Small tile targets so the demo exercises both grid axes (2 M-tiles x
    # 2 H-reduction steps), the fused w1/w3 dot, and the store-then-accumulate
    # path.  Production calls omit these and get the per-generation defaults.
    out = feed_forward(x, w1, w2, w3, tm_target=64, th_target=128)
    out = jax.block_until_ready(out)

    ref = feed_forward_ref(x, w1, w2, w3)
    assert out.shape == (batch, seq, dim), out.shape
    err = float(jnp.max(jnp.abs(out.astype(jnp.float32) - ref.astype(jnp.float32))))
    assert err < 2e-2, err
    print("KERNEL_OK")
</pallas_src>

<mosaic_0001>
module attributes {stable_mosaic.version = 11 : i64} {
  func.func @_ffn_kernel(%arg0: i32, %arg1: i32, %arg2: memref<64x128xbf16, #tpu.memory_space<vmem>>, %arg3: memref<256x128xbf16, #tpu.memory_space<vmem>>, %arg4: memref<128x128xbf16, #tpu.memory_space<vmem>>, %arg5: memref<64x128xbf16, #tpu.memory_space<vmem>>, %arg6: memref<64x128xf32, #tpu.memory_space<vmem>>) attributes {dimension_semantics = [#tpu.dimension_semantics<parallel>, #tpu.dimension_semantics<arbitrary>], iteration_bounds = array<i64: 2, 2>, scalar_prefetch = 0 : i64, scratch_operands = 1 : i64, tpu.core_type = #tpu.core_type<tc>, window_params = [{transform_indices = @transform_0, window_bounds = array<i64: 64, 128>}, {transform_indices = @transform_1, window_bounds = array<i64: 256, 128>}, {transform_indices = @transform_2, window_bounds = array<i64: 128, 128>}, {transform_indices = @transform_3, window_bounds = array<i64: 64, 128>}]} {
    %c0 = arith.constant 0 : index
    %c0_0 = arith.constant 0 : index
    %0 = vector.load %arg2[%c0, %c0_0] : memref<64x128xbf16, #tpu.memory_space<vmem>>, vector<64x128xbf16>
    %c0_1 = arith.constant 0 : index
    %c0_2 = arith.constant 0 : index
    %1 = vector.load %arg3[%c0_1, %c0_2] : memref<256x128xbf16, #tpu.memory_space<vmem>>, vector<256x128xbf16>
    %cst = arith.constant dense<0.000000e+00> : vector<64x256xf32>
    %2 = tpu.matmul %0, %1, %cst {dimension_numbers = #tpu.dot_dimension_numbers<[1], [1], [0], [0], [0, 0, 1, 0], [], []>} : vector<64x128xbf16>, vector<256x128xbf16>, vector<64x256xf32> -> vector<64x256xf32>
    %3 = vector.extract_strided_slice %2 {offsets = [0, 0], sizes = [64, 128], strides = [1, 1]} : vector<64x256xf32> to vector<64x128xf32>
    %4 = vector.extract_strided_slice %2 {offsets = [0, 128], sizes = [64, 128], strides = [1, 1]} : vector<64x256xf32> to vector<64x128xf32>
    %5 = arith.negf %3 : vector<64x128xf32>
    %6 = math.exp %5 : vector<64x128xf32>
    %cst_3 = arith.constant 1.000000e+00 : f32
    %7 = vector.broadcast %cst_3 : f32 to vector<64x128xf32>
    %8 = arith.addf %7, %6 : vector<64x128xf32>
    %9 = arith.divf %7, %8 : vector<64x128xf32>
    %10 = arith.mulf %3, %9 : vector<64x128xf32>
    %11 = arith.mulf %10, %4 : vector<64x128xf32>
    %12 = arith.truncf %11 : vector<64x128xf32> to vector<64x128xbf16>
    %c0_4 = arith.constant 0 : index
    %c0_5 = arith.constant 0 : index
    %13 = vector.load %arg4[%c0_4, %c0_5] : memref<128x128xbf16, #tpu.memory_space<vmem>>, vector<128x128xbf16>
    %cst_6 = arith.constant dense<0.000000e+00> : vector<64x128xf32>
    %14 = tpu.matmul %12, %13, %cst_6 {dimension_numbers = #tpu.dot_dimension_numbers<[1], [1], [0], [0], [0, 0, 1, 0], [], []>} : vector<64x128xbf16>, vector<128x128xbf16>, vector<64x128xf32> -> vector<64x128xf32>
    %c0_i32 = arith.constant 0 : i32
    %15 = arith.cmpi eq, %arg1, %c0_i32 : i32
    %16 = arith.extui %15 : i1 to i32
    %c0_i32_7 = arith.constant 0 : i32
    %17 = arith.cmpi ne, %16, %c0_i32_7 : i32
    scf.if %17 {
      %c0_11 = arith.constant 0 : index
      %c0_12 = arith.constant 0 : index
      %24 = vector.load %arg6[%c0_11, %c0_12] : memref<64x128xf32, #tpu.memory_space<vmem>>, vector<64x128xf32>
      tpu.vector_store %arg6[%c0_11, %c0_12], %14 {strides = array<i32>} : memref<64x128xf32, #tpu.memory_space<vmem>>, vector<64x128xf32>,
    } else {
    }
    %c0_i32_8 = arith.constant 0 : i32
    %18 = arith.cmpi sgt, %arg1, %c0_i32_8 : i32
    %19 = arith.extui %18 : i1 to i32
    %c0_i32_9 = arith.constant 0 : i32
    %20 = arith.cmpi ne, %19, %c0_i32_9 : i32
    scf.if %20 {
      %c0_11 = arith.constant 0 : index
      %c0_12 = arith.constant 0 : index
      %24 = vector.load %arg6[%c0_11, %c0_12] : memref<64x128xf32, #tpu.memory_space<vmem>>, vector<64x128xf32>
      %25 = arith.addf %24, %14 : vector<64x128xf32>
      %c0_13 = arith.constant 0 : index
      %c0_14 = arith.constant 0 : index
      %26 = vector.load %arg6[%c0_13, %c0_14] : memref<64x128xf32, #tpu.memory_space<vmem>>, vector<64x128xf32>
      tpu.vector_store %arg6[%c0_13, %c0_14], %25 {strides = array<i32>} : memref<64x128xf32, #tpu.memory_space<vmem>>, vector<64x128xf32>,
    } else {
    }
    %c1_i32 = arith.constant 1 : i32
    %21 = arith.cmpi eq, %arg1, %c1_i32 : i32
    %22 = arith.extui %21 : i1 to i32
    %c0_i32_10 = arith.constant 0 : i32
    %23 = arith.cmpi ne, %22, %c0_i32_10 : i32
    scf.if %23 {
      %c0_11 = arith.constant 0 : index
      %c0_12 = arith.constant 0 : index
      %24 = vector.load %arg6[%c0_11, %c0_12] : memref<64x128xf32, #tpu.memory_space<vmem>>, vector<64x128xf32>
      %25 = arith.truncf %24 : vector<64x128xf32> to vector<64x128xbf16>
      %c0_13 = arith.constant 0 : index
      %c0_14 = arith.constant 0 : index
      %26 = vector.load %arg5[%c0_13, %c0_14] : memref<64x128xbf16, #tpu.memory_space<vmem>>, vector<64x128xbf16>
      tpu.vector_store %arg5[%c0_13, %c0_14], %25 {strides = array<i32>} : memref<64x128xbf16, #tpu.memory_space<vmem>>, vector<64x128xbf16>,
    } else {
    }
    return
  }
  func.func @transform_0(%arg0: i32, %arg1: i32) -> (i32, i32) {
    %c0_i32 = arith.constant 0 : i32
    %c0_i32_0 = arith.constant 0 : i32
    return %arg0, %c0_i32 : i32, i32
  }
  func.func @transform_1(%arg0: i32, %arg1: i32) -> (i32, i32) {
    %c0_i32 = arith.constant 0 : i32
    %c0_i32_0 = arith.constant 0 : i32
    return %arg1, %c0_i32 : i32, i32
  }
  func.func @transform_2(%arg0: i32, %arg1: i32) -> (i32, i32) {
    %c0_i32 = arith.constant 0 : i32
    %c0_i32_0 = arith.constant 0 : i32
    return %c0_i32, %arg1 : i32, i32
  }
  func.func @transform_3(%arg0: i32, %arg1: i32) -> (i32, i32) {
    %c0_i32 = arith.constant 0 : i32
    %c0_i32_0 = arith.constant 0 : i32
    return %arg0, %c0_i32 : i32, i32
  }
}

</mosaic_0001>

<bundles_post_ra>
// kernel: tpu_custom_call.1
= control target key start
LH: loop header
LB: loop body
LE: loop exit
PB: predicated region body
PF: predicated region fallthrough
CT: control target
= control target key end

     0   :  { %s1972_s0 = inlined_call_operand.hbm [shape: bf16[128,128], index: 0, kind: input, shape index: {}]   ;;  %s1973_s1 = inlined_call_operand.hbm [shape: bf16[512,128], index: 1, kind: input, shape index: {}]   ;;  %s1974_s2 = inlined_call_operand.hbm [shape: bf16[128,256], index: 2, kind: input, shape index: {}]   ;;  %s1975_s3 = inlined_call_operand.hbm [shape: bf16[128,128], index: 3, kind: output, shape index: {}]  }
   0x1   :  { %1992 = sst [smem:[#allocation26_spill]] %s1973_s1 }
   0x2   :  { %1993 = sst [smem:[#allocation27_spill]] %s1975_s3 }
   0x3   :  { %8 = vsyncpa [#allocation4], 0 }
   0x4   :  { %10 = vsyncpa [#allocation4 + $0x1], 0 }
   0x5   :  { %11 = vsyncpa [#allocation7], 0 }
   0x6   :  { %13 = vsyncpa [#allocation7 + $0x1], 0 }
   0x7   :  { %14 = vsyncpa [#allocation5], 0 }
   0x8   :  { %16 = vsyncpa [#allocation5 + $0x1], 0  ;;  %s1579_s12 = smov 0   ;;  %s1581_s13 = smov 0  }
   0x9   :  { %s1583_s14 = smov 0   ;;  %s1585_s15 = smov 0  }
   0xa   :  { %s1587_s16 = smov 0   ;;  %s1589_s17 = smov 0  }
   0xb   :  { %s1591_s18 = smov 0   ;;  %s1593_s19 = smov 0  }
   0xc   :  { %s1595_s20 = smov 0   ;;  %s1597_s21 = smov 0  }
   0xd   :  { %s1599_s22 = smov 0  }
   0xe LB: > { %1994 = sst [smem:[#allocation13_spill]] %s1520_s14  ;;  %s1633_s23 = sadd.s32 4294967295, %s1552_s22   ;;  %s1552_s22 = sphi %s1599_s22, %s22_s22   ;;  %s1548_s21 = sphi %s1597_s21, %s2040_s21   ;;  %s1544_s20 = sphi %s1595_s20, %s2046_s20   ;;  %s1540_s19 = sphi %s1593_s19, %s2038_s19   ;;  %s1536_s18 = sphi %s1591_s18, %s2045_s18   ;;  %s1532_s17 = sphi %s1589_s17, %s2037_s17   ;;  %s1528_s16 = sphi %s1587_s16, %s2044_s16   ;;  %s1524_s15 = sphi %s1585_s15, %s2043_s15   ;;  %s1520_s14 = sphi %s1583_s14, %s2035_s14   ;;  %s1516_s13 = sphi %s1581_s13, %s2042_s13   ;;  %s1512_s12 = sphi %s1579_s12, %s2041_s12  }
   0xf   : > { %1995 = sst [smem:[#allocation14_spill]] %s1524_s15  ;;  %s31_s24 = sadd.s32 1, %s1544_s20 }
  0x10   : > { %1996 = sst [smem:[#allocation15_spill]] %s1532_s17  ;;  %p1636_p0 = scmp.ge.s32.totalorder %s31_s24, 2 }
  0x11   : > { %1997 = sst [smem:[#allocation16_spill]] %s1536_s18  ;;  %p49_p1 = scmp.eq.s32.totalorder %s1552_s22, 0 }
  0x12   : > { %1998 = sst [smem:[#allocation17_spill]] %s1540_s19  ;;  %p55_p2 = scmp.eq.s32.totalorder %s1633_s23, 0 }
  0x13   : > { %1999 = sst [smem:[#allocation18_spill]] %s1548_s21  ;;  %s67_s26 = sadd.s32 1, %s1520_s14 }
  0x14   : > { %s2048_s24 = smov (%p1636_p0, %s31_s24), 0  ;;  %p74_p3 = scmp.ne.s32.totalorder %s1520_s14, %s1516_s13 }
  0x15   : > { %2001 = sst [smem:[#allocation19_spill]] %s2048_s24  ;;  %p80_p4 = scmp.ne.s32.totalorder %s1516_s13, %s1512_s12 }
  0x16   : > { %s64_s27 = ssub.s32 %s1544_s20, %s2048_s24  ;;  %p1654_p6 = por %p74_p3, %p49_p1 }
  0x17   : > { %p65_p5 = scmp.eq.s32.totalorder %s64_s27, 0  ;;  %p1660_p7 = por %p80_p4, %p55_p2 }
  0x18   : > { %p1976_p8 = scmp.lt.s32.totalorder %s1552_s22, 4  ;;  %s178_s4 = sand.u32 1, %s1552_s22  }
  0x19   : > { %s1666_s30 = scalar_select %p65_p5, %s1520_s14, %s67_s26  }
  0x1a   : > { %s180_s5 = sand.u32 1, %s1520_s14   ;;  %s1126_s7 = sshll.u32 %s1544_s20, 7 }
  0x1b   : > { %2004 = sst [smem:[#allocation20_spill]] %s1666_s30  ;;  %s987_s6 = sshll.u32 %s180_s5, 7 }
  0x1c   : > { %s2005_s1 = sld [smem:[#allocation26_spill]]  ;;  %s182_s11 = scalar_lea.vmem [#allocation6], %s987_s6 }
  0x1d   : > { %s190_s12 = sshll.u32 %s182_s11, 4  ;;  %p1678_p9 = pnand %p1976_p8, %p1654_p6  ;;  %s191_s12 = int_to_ptr.vmem [resolvable:$true] %s190_s12 }
  0x1e   : > { %p992_p10 = scmp.ge.s32.totalorder %s1552_s22, 1  ;;  %s1683_s6 = scalar_lea.sflag [#allocation7], %s178_s4 }
  0x1f   : > { %s1977_s8 = smov 64   ;;  %s1979_s28 = smov 4  }
  0x20   : > { %p219_p11 = scmp.lt.s32.totalorder %s1552_s22, 5  ;;  %s34_s11 = sadd.s32 1, %s1548_s21 }
  0x21   : > { %s2050_s11 = smov (!%p1636_p0, %s34_s11), %s1548_s21  ;;  %p48_p13 = scmp.ne.s32.totalorder %s1532_s17, %s1528_s16 }
  0x22   : > { %s187_s10 = scalar_lea.hbm %s2005_s1, %s1126_s7  ;;  %s990_s7 = sshll.u32 %s180_s5, 6 }
  0x23   : > { %s188_s27 = sshll.u32 %s187_s10, 4  ;;  %s204_s9 = scalar_lea.vmem [#allocation8], %s990_s7  ;;  %s189_s27 = int_to_ptr.hbm [resolvable:$true] %s188_s27 }
  0x24   : > { %1201 = dma.hbm_to_vmem [thread:$0]  (!%p1678_p9), %s189_s27, 2048, %s191_s12, %s1683_s6, %s1977_s8, %s1977_s8, %s1979_s28  }
  0x25   : > { %s1691_s10 = sshll.u32 %s204_s9, 4  ;;  %p1695_p12 = pnand %p992_p10, %p219_p11 }
  0x26   : > { %2007 = sst [smem:[#allocation21_spill]] %s1691_s10  ;;  %s981_s5 = sadd.s32 4294967294, %s1552_s22  }
  0x27   : > { %s41_s1 = sadd.s32 1, %s1532_s17  ;;  %p36_p3 = scmp.ge.s32.totalorder %s2050_s11, 2 }
  0x28   : > { %p54_p4 = scmp.ne.s32.totalorder %s1528_s16, %s1524_s15  ;;  %p1711_p5 = por %p49_p1, %p48_p13 }
  0x29   : > { %p130_p6 = scmp.eq.s32.totalorder %s1633_s23, 3  ;;  %s2052_s11 = smov (%p36_p3, %s2050_s11), 0 }
  0x2a   : > { %2010 = sst [smem:[#allocation22_spill]] %s2052_s11  ;;  %p1720_p10 = por %p55_p2, %p54_p4 }
  0x2b   : > { %p1724_p0 = por %p130_p6, %p48_p13  ;;  %s38_s7 = ssub.s32 %s1548_s21, %s2052_s11 }
  0x2c   : > { %p136_p1 = scmp.eq.s32.totalorder %s981_s5, 3  ;;  %p39_p11 = scmp.eq.s32.totalorder %s38_s7, 0 }
  0x2d   : > { %s2012_s25 = scalar_select %p1724_p0, 1, 0 }
  0x2e   : > { %s156_s9 = sand.u32 1, %s1532_s17   ;;  %p1731_p8 = por %p136_p1, %p54_p4 }
  0x2f   : > { %2013 = sst [smem:[#allocation23_spill]] %s2012_s25  ;;  %s984_s10 = sshll.u32 %s156_s9, 5 }
  0x30   : > { %s2014_s8 = scalar_select %p1731_p8, 1, 0 }
  0x31   : > { %s1736_s28 = scalar_select %p39_p11, %s1532_s17, %s41_s1  }
  0x32   : > { %2015 = sst [smem:[#allocation24_spill]] %s2014_s8  ;;  %s1125_s30 = sshll.u32 %s1548_s21, 5 }
  0x33   : > { %2016 = sst [smem:[#allocation25_spill]] %s1736_s28  ;;  %s165_s3 = scalar_lea.hbm %s1972_s0, %s1125_s30 }
  0x34   : > { %s2017_s24 = sld [smem:[#allocation21_spill]]  ;;  %s166_s25 = sshll.u32 %s165_s3, 4  ;;  %s167_s25 = int_to_ptr.hbm [resolvable:$true] %s166_s25 }
  0x35   : > { %s160_s11 = scalar_lea.vmem [#allocation3], %s984_s10  ;;  %p2018_p2 = scmp.lt.s32.totalorder %s1552_s22, 4 }
  0x36   : > { %s168_s5 = sshll.u32 %s160_s11, 4  ;;  %s991_s7 = sshll.u32 %s1544_s20, 2  ;;  %s169_s5 = int_to_ptr.vmem [resolvable:$true] %s168_s5 }
  0x37   : > { %p1196_p13 = pnand %p2018_p2, %p1711_p5  ;;  %s208_s17 = scalar_lea.hbm %s1974_s2, %s991_s7 }
  0x38   : > { %s209_s8 = sshll.u32 %s208_s17, 4  ;;  %s157_s19 = scalar_lea.sflag [#allocation4], %s156_s9  ;;  %s210_s8 = int_to_ptr.hbm [resolvable:$true] %s209_s8 }
  0x39   : > { %s2019_s21 = smov 4   ;;  %s2020_s18 = smov 64  }
  0x3a   : > { %1198 = dma.hbm_to_vmem [thread:$0]  (!%p1196_p13), %s167_s25, 512, %s169_s5, %s157_s19, %s2020_s18, %s2020_s18, %s2019_s21  }
  0x3b   : > { %s1556_s3 = smov 128   ;;  %s2021_s14 = int_to_ptr.vmem [resolvable:$true] %s2017_s24 }
  0x3c   : > { %1204 = dma.hbm_to_vmem [thread:$0]  (!%p1678_p9), %s210_s8, 1024, %s2021_s14, %s1683_s6, %s1556_s3, %s2020_s18, %s2019_s21  }
  0x3d   : > { %223 = sbr.rel (%p1695_p12) target bundleno = 565 (0x235), region = 32  ;;  %s1763_s15 = sand.u32 (!%p1695_p12), 1, %s1528_s16  }
  0x3e   : > { %s993_s17 = sshll.u32 (!%p1695_p12), %s1763_s15, 5  ;;  %s226_s30 = scalar_lea.sflag (!%p1695_p12), [#allocation4], %s1763_s15 }
  0x3f   : > { %s1769_s19 = scalar_lea.vmem (!%p1695_p12), [#allocation3], %s993_s17 }
  0x42   : > { %1499 = dma.done.wait (%p1720_p10), %s226_s30, 512  }
  0x43   : > { %1501 = vsyncadd (%p1720_p10), %s226_s30, 4294966784  ;;  %s235_s18 = sand.u32 1, %s1633_s23   ;;  %s237_s21 = sand.u32 1, %s1516_s13  }
  0x44   : > { %s994_s24 = sshll.u32 %s237_s21, 7  ;;  %s236_s26 = scalar_lea.sflag [#allocation7], %s235_s18 }
  0x45   : > { %s1779_s6 = scalar_lea.vmem [#allocation6], %s994_s24 }
  0x46   : > { %1503 = dma.done.wait (%p1660_p7), %s236_s26, 3072  }
  0x47   : > { %1505 = vsyncadd (%p1660_p7), %s236_s26, 4294964224  ;;  %v1138_v0 = vld [vmem:[%s1779_s6 + $0x38] sm:$0xff]  ;;  %v1137_v2 = vld [vmem:[%s1779_s6 + $0x30] sm:$0xff]  ;;  %s995_s23 = sshll.u32 %s237_s21, 6  ;;  %s1910_s8 = scalar_lea.vmem [#allocation9], %s993_s17 }
  0x48   : > { %v1146_v1 = vld [vmem:[%s1779_s6 + $0x78] sm:$0xff]  ;;  %446 = vmatpush.bf16.xpose.msra.mxu0 %v1138_v0  ;;  %1179 = vmatpush.bf16.xpose.msra.mxu3 %v1138_v0  ;;  %v1145_v3 = vld [vmem:[%s1779_s6 + $0x70] sm:$0xff]  ;;  %v1136_v4 = vld [vmem:[%s1779_s6 + $0x28] sm:$0xff]  ;;  %s249_s29 = scalar_lea.vmem [#allocation8], %s995_s23  ;;  %s2026_s28 = sld [smem:[#allocation16_spill]] }
  0x49   : > { %475 = vmatpush.bf16.xpose.msra.mxu1 %v1146_v1  ;;  %v1144_v5 = vld [vmem:[%s1779_s6 + $0x68] sm:$0xff]  ;;  %v1135_v6 = vld [vmem:[%s1779_s6 + $0x20] sm:$0xff]  ;;  %v1134_v8 = vld [vmem:[%s1779_s6 + $0x18] sm:$0xff] }
  0x4a   : > { %v1143_v7 = vld [vmem:[%s1779_s6 + $0x60] sm:$0xff]  ;;  %v1142_v9 = vld [vmem:[%s1779_s6 + $0x58] sm:$0xff]  ;;  %v1133_v10 = vld [vmem:[%s1779_s6 + $0x10] sm:$0xff] }
  0x4b   : > { %v1141_v11 = vld [vmem:[%s1779_s6 + $0x50] sm:$0xff]  ;;  %v1132_v12 = vld [vmem:[%s1779_s6 + $0x8] sm:$0xff]  ;;  %v1131_v14 = vld [vmem:[%s1779_s6] sm:$0xff] }
  0x4c   : > { %v1140_v13 = vld [vmem:[%s1779_s6 + $0x48] sm:$0xff]  ;;  %v1139_v15 = vld [vmem:[%s1779_s6 + $0x40] sm:$0xff]  ;;  %v1129_v18 = vld [vmem:[%s1769_s19 + $0x10] sm:$0xff] }
  0x4d   : > { %v1127_v16 = vld [vmem:[%s1769_s19] sm:$0xff]  ;;  %v1128_v17 = vld [vmem:[%s1769_s19 + $0x8] sm:$0xff]  ;;  %v1154_v19 = vld [vmem:[%s249_s29 + $0x38] sm:$0xff] }
  0x4e   : > { %740 = vmatpush.bf16.xpose.msra.mxu2 %v1154_v19  ;;  %v1153_v20 = vld [vmem:[%s249_s29 + $0x30] sm:$0xff]  ;;  %v1130_v21 = vld [vmem:[%s1769_s19 + $0x18] sm:$0xff]  ;;  %v1152_v22 = vld [vmem:[%s249_s29 + $0x28] sm:$0xff]  ;;  %p1117_p7 = scmp.ne.s32.totalorder %s2026_s28, 0 }
  0x4f   : > { %v1151_v23 = vld [vmem:[%s249_s29 + $0x20] sm:$0xff]  ;;  %v1150_v24 = vld [vmem:[%s249_s29 + $0x18] sm:$0xff]  ;;  %v1149_v25 = vld [vmem:[%s249_s29 + $0x10] sm:$0xff] }
  0x50   : > { %447 = vmatpush.bf16.xpose.msra.mxu0 %v1137_v2  ;;  %1180 = vmatpush.bf16.xpose.msra.mxu3 %v1137_v2  ;;  %v1148_v26 = vld [vmem:[%s249_s29 + $0x8] sm:$0xff]  ;;  %v1147_v29 = vld [vmem:[%s249_s29] sm:$0xff] }
  0x51   : > { %476 = vmatpush.bf16.xpose.msra.mxu1 %v1145_v3 }
  0x56   : > { %741 = vmatpush.bf16.xpose.msra.mxu2 %v1153_v20 }
  0x58   : > { %448 = vmatpush.bf16.xpose.msra.mxu0 %v1136_v4  ;;  %1181 = vmatpush.bf16.xpose.msra.mxu3 %v1136_v4 }
  0x59   : > { %477 = vmatpush.bf16.xpose.msra.mxu1 %v1144_v5 }
  0x5e   : > { %742 = vmatpush.bf16.xpose.msra.mxu2 %v1152_v22 }
  0x60   : > { %449 = vmatpush.bf16.xpose.msra.mxu0 %v1135_v6  ;;  %1182 = vmatpush.bf16.xpose.msra.mxu3 %v1135_v6 }
  0x61   : > { %478 = vmatpush.bf16.xpose.msra.mxu1 %v1143_v7 }
  0x66   : > { %743 = vmatpush.bf16.xpose.msra.mxu2 %v1151_v23 }
  0x68   : > { %450 = vmatpush.bf16.xpose.msra.mxu0 %v1134_v8  ;;  %1183 = vmatpush.bf16.xpose.msra.mxu3 %v1134_v8 }
  0x69   : > { %479 = vmatpush.bf16.xpose.msra.mxu1 %v1142_v9 }
  0x6e   : > { %744 = vmatpush.bf16.xpose.msra.mxu2 %v1150_v24 }
  0x70   : > { %451 = vmatpush.bf16.xpose.msra.mxu0 %v1133_v10  ;;  %1184 = vmatpush.bf16.xpose.msra.mxu3 %v1133_v10 }
  0x71   : > { %480 = vmatpush.bf16.xpose.msra.mxu1 %v1141_v11 }
  0x76   : > { %745 = vmatpush.bf16.xpose.msra.mxu2 %v1149_v25 }
  0x78   : > { %452 = vmatpush.bf16.xpose.msra.mxu0 %v1132_v12  ;;  %1185 = vmatpush.bf16.xpose.msra.mxu3 %v1132_v12 }
  0x79   : > { %481 = vmatpush.bf16.xpose.msra.mxu1 %v1140_v13 }
  0x7e   : > { %746 = vmatpush.bf16.xpose.msra.mxu2 %v1148_v26 }
  0x80   : > { %453 = vmatpush.bf16.xpose.msra.mxu0 %v1131_v14  ;;  %1186 = vmatpush.bf16.xpose.msra.mxu3 %v1131_v14 }
  0x81   : > { %482 = vmatpush.bf16.xpose.msra.mxu1 %v1139_v15 }
  0x86   : > { %747 = vmatpush.bf16.xpose.msra.mxu2 %v1147_v29 }
  0x87   : > { %454 = vmatmul.bf16.vlgmr.msra.gmra.mxu0 %v1127_v16  ;;  %459 = vmatmul.bf16.vlgmr.msra.gmra.mxu3 %v1128_v17 }
  0x88   : > { %483 = vmatmul.bf16.vlgmr.msra.gmra.mxu1 %v1127_v16 }
  0x97   : > { %464 = vmatmul.bf16.gmra.mxu3 %v1129_v18 }
  0x98   : > { %488 = vmatmul.bf16.gmra.mxu1 %v1128_v17 }
  0xa7   : > { %469 = vmatmul.bf16.gmra.mxu3 %v1130_v21 }
  0xa8   : > { %493 = vmatmul.bf16.gmra.mxu1 %v1129_v18 }
  0xb8   : > { %498 = vmatmul.bf16.gmra.mxu1 %v1130_v21 }
 0x104   : > { %v1807_v27 = vpop.f32.mrf.mxu0 }
 0x105   : > { %v1077_v28 = vmul.f32 -1.442695, %v1807_v27  ;;  %v1818_v37 = vpop.f32.mrf.mxu1 }
 0x107   : > { %1304 = vpow2.f32 %v1077_v28 }
 0x10a   : > { %v1810_v30 = vpop.f32.mrf.mxu3 }
 0x10b   : > { %v1079_v31 = vmul.f32 -1.442695, %v1810_v30 }
 0x10c   : > { %v1813_v32 = vpop.f32.mrf.mxu0 }
 0x10d   : > { %v1305_v33 = vpop.eup %1304  ;;  %1306 = vpow2.f32 %v1079_v31  ;;  %v1078_v34 = vmul.f32 -1.442695, %v1813_v32  ;;  %v486_v51 = vpop.f32.mrf.mxu1 }
 0x10e   : > { %v528_v35 = vadd.f32 1.0, %v1305_v33 }
 0x10f   : > { %1308 = vpow2.f32 %v1078_v34 }
 0x110   : > { %1310 = vrcp.f32 %v528_v35  ;;  %v547_v55 = vand.u32 2147483648, %v528_v35  ;;  %vm541_vm1 = vweird.f32 %v528_v35  ;;  %v545_v57 = vand.u32 2147483647, %v528_v35 }
 0x112   : > { %v1816_v36 = vpop.f32.mrf.mxu3  ;;  %v548_v3 = vor.u32 1.1754944e-38, %v547_v55  ;;  %vm546_vm4 = vcmp.eq.f32.partialorder %v545_v57, 8.507059e+37 }
 0x113   : > { %v1307_v38 = vpop.eup %1306  ;;  %v1080_v39 = vmul.f32 -1.442695, %v1816_v36 }
 0x114   : > { %v1821_v42 = vadd.f32 1.0, %v1307_v38 }
 0x115   : > { %v1309_v40 = vpop.eup %1308  ;;  %1312 = vpow2.f32 %v1080_v39  ;;  %v1846_v10 = vpop.f32.mrf.mxu1 }
 0x116   : > { %v1311_v41 = vpop.eup %1310  ;;  %v529_v44 = vadd.f32 1.0, %v1309_v40  ;;  %vm571_vm9 = vweird.f32 %v1821_v42  ;;  %v577_v33 = vand.u32 2147483648, %v1821_v42 }
 0x117   : > { %v537_v43 = vmul.f32 %v1311_v41, %v528_v35  ;;  %vm542_vm0 = vweird.f32 %v1311_v41 }
 0x118   : > { %1314 = vrcp.f32 %v529_v44  ;;  %vm1832_vm2 = vmor %vm541_vm1, %vm542_vm0  ;;  %v562_v0 = vand.u32 2147483648, %v529_v44  ;;  %v560_v5 = vand.u32 2147483647, %v529_v44  ;;  %vm556_vm5 = vweird.f32 %v529_v44 }
 0x119   : > { %v538_v45 = vsub.f32 1.0, %v537_v43  ;;  %1316 = vrcp.f32 %v1821_v42 }
 0x11a   : > { %v1824_v46 = vpop.f32.mrf.mxu3  ;;  %v563_v12 = vor.u32 1.1754944e-38, %v562_v0  ;;  %vm561_vm7 = vcmp.eq.f32.partialorder %v560_v5, 8.507059e+37 }
 0x11b   : > { %v1313_v47 = vpop.eup %1312  ;;  %v539_v48 = vmul.f32 %v1311_v41, %v538_v45  ;;  %v1081_v49 = vmul.f32 -1.442695, %v1824_v46 }
 0x11c   : > { %v1827_v50 = vadd.f32 1.0, %v1313_v47 }
 0x11d   : > { %1318 = vpow2.f32 %v1081_v49  ;;  %v540_v53 = vadd.f32 %v1311_v41, %v539_v48  ;;  %v491_v35 = vpop.f32.mrf.mxu1  ;;  %v578_v48 = vor.u32 1.1754944e-38, %v577_v33 }
 0x11e   : > { %1320 = vrcp.f32 %v1827_v50  ;;  %v1315_v52 = vpop.eup %1314  ;;  %vm586_vm11 = vweird.f32 %v1827_v50  ;;  %v590_v29 = vand.u32 2147483647, %v1827_v50 }
 0x11f   : > { %v1830_v54 = vpop.eup %1316  ;;  %v552_v56 = vmul.f32 %v1315_v52, %v529_v44  ;;  %v544_v62 = vsel %vm1832_vm2, %v1311_v41, %v540_v53  ;;  %vm557_vm3 = vweird.f32 %v1315_v52 }
 0x120   : > { %v567_v63 = vmul.f32 %v1830_v54, %v1821_v42  ;;  %v549_v7 = vsel %vm546_vm4, %v548_v3, %v544_v62  ;;  %vm558_vm6 = vmor %vm556_vm5, %vm557_vm3  ;;  %vm572_vm10 = vweird.f32 %v1830_v54  ;;  %vm591_vm14 = vcmp.eq.f32.partialorder %v590_v29, 8.507059e+37 }
 0x121   : > { %v553_v59 = vsub.f32 1.0, %v552_v56  ;;  %v656_v15 = vmul.f32 %v549_v7, %v1807_v27  ;;  %v592_v27 = vand.u32 2147483648, %v1827_v50  ;;  %vm573_vm13 = vmor %vm571_vm9, %vm572_vm10 }
 0x122   : > { %v1836_v60 = vpop.f32.mrf.mxu3  ;;  %v568_v11 = vsub.f32 1.0, %v567_v63 }
 0x123   : > { %v1319_v61 = vpop.eup %1318  ;;  %v1082_v1 = vmul.f32 -1.442695, %v1836_v60  ;;  %v554_v4 = vmul.f32 %v1315_v52, %v553_v59  ;;  %v664_v26 = vmul.f32 %v656_v15, %v1818_v37  ;;  %v575_v37 = vand.u32 2147483647, %v1821_v42 }
 0x124   : > { %v1321_v2 = vpop.eup %1320  ;;  %v1844_v9 = vadd.f32 1.0, %v1319_v61  ;;  %v569_v21 = vmul.f32 %v1830_v54, %v568_v11  ;;  %v593_v39 = vor.u32 1.1754944e-38, %v592_v27 }
 0x125   : > { %v582_v6 = vmul.f32 %v1321_v2, %v1827_v50  ;;  %1322 = vpow2.f32 %v1082_v1  ;;  %v555_v8 = vadd.f32 %v1315_v52, %v554_v4  ;;  %vm587_vm8 = vweird.f32 %v1321_v2  ;;  %v494_v57 = vpop.f32.mrf.mxu1 }
 0x126   : > { %1324 = vrcp.f32 %v1844_v9  ;;  %v570_v28 = vadd.f32 %v1830_v54, %v569_v21  ;;  %vm1868_vm12 = vmor %vm586_vm11, %vm587_vm8  ;;  %vm576_vm15 = vcmp.eq.f32.partialorder %v575_v37, 8.507059e+37  ;;  %vm601_vm1 = vweird.f32 %v1844_v9 }
 0x127   : > { %v583_v13 = vsub.f32 1.0, %v582_v6  ;;  %v559_v14 = vsel %vm558_vm6, %v1315_v52, %v555_v8  ;;  %v607_v4 = vand.u32 2147483648, %v1844_v9  ;;  %v605_v5 = vand.u32 2147483647, %v1844_v9 }
 0x128   : > { %v564_v16 = vsel %vm561_vm7, %v563_v12, %v559_v14  ;;  %v574_v43 = vsel %vm573_vm13, %v1830_v54, %v570_v28 }
 0x129   : > { %v584_v17 = vmul.f32 %v1321_v2, %v583_v13  ;;  %v657_v18 = vmul.f32 %v564_v16, %v1813_v32  ;;  %v579_v42 = vsel %vm576_vm15, %v578_v48, %v574_v43  ;;  %v608_v12 = vor.u32 1.1754944e-38, %v607_v4 }
 0x12a   : > { %v1851_v19 = vpop.f32.mrf.mxu3  ;;  %v658_v55 = vmul.f32 %v579_v42, %v1810_v30  ;;  %vm606_vm7 = vcmp.eq.f32.partialorder %v605_v5, 8.507059e+37 }
 0x12b   : > { %v1323_v20 = vpop.eup %1322  ;;  %v1083_v22 = vmul.f32 -1.442695, %v1851_v19  ;;  %v665_v23 = vmul.f32 %v657_v18, %v486_v51  ;;  %v585_v25 = vadd.f32 %v1321_v2, %v584_v17 }
 0x12c   : > { %v1855_v24 = vadd.f32 1.0, %v1323_v20  ;;  %v1865_v32 = vpop.eup %1324  ;;  %v666_v0 = vmul.f32 %v658_v55, %v1846_v10 }
 0x12d   : > { %1326 = vpow2.f32 %v1083_v22  ;;  %v672_v31 = vpack.c.bf16 %v665_v23, %v664_v26  ;;  %v589_v38 = vsel %vm1868_vm12, %v1321_v2, %v585_v25  ;;  %v597_v44 = vmul.f32 %v1865_v32, %v1844_v9  ;;  %v496_v14 = vpop.f32.mrf.mxu1 }
 0x12e   : > { %1328 = vrcp.f32 %v1855_v24  ;;  %v594_v49 = vsel %vm591_vm14, %v593_v39, %v589_v38  ;;  %vm602_vm2 = vweird.f32 %v1865_v32  ;;  %vm616_vm3 = vweird.f32 %v1855_v24 }
 0x12f   : > { %748 = vmatmul.bf16.vlgmr.msra.gmra.mxu2 %v672_v31  ;;  %v659_v52 = vmul.f32 %v594_v49, %v1816_v36  ;;  %v598_v53 = vsub.f32 1.0, %v597_v44  ;;  %v622_v36 = vand.u32 2147483648, %v1855_v24  ;;  %v620_v1 = vand.u32 2147483647, %v1855_v24  ;;  %vm603_vm5 = vmor %vm601_vm1, %vm602_vm2 }
 0x131   : > { %v599_v59 = vmul.f32 %v1865_v32, %v598_v53  ;;  %v667_v61 = vmul.f32 %v659_v52, %v491_v35  ;;  %v623_v7 = vor.u32 1.1754944e-38, %v622_v36  ;;  %vm621_vm6 = vcmp.eq.f32.partialorder %v620_v1, 8.507059e+37 }
 0x132   : > { %v1877_v40 = vpop.f32.mrf.mxu3 }
 0x133   : > { %v1327_v41 = vpop.eup %1326  ;;  %v1084_v45 = vmul.f32 -1.442695, %v1877_v40  ;;  %v600_v30 = vadd.f32 %v1865_v32, %v599_v59  ;;  %v673_v2 = vpack.c.bf16 %v667_v61, %v666_v0 }
 0x134   : > { %v1329_v47 = vpop.eup %1328  ;;  %v1884_v51 = vadd.f32 1.0, %v1327_v41 }
 0x135   : > { %v612_v50 = vmul.f32 %v1329_v47, %v1855_v24  ;;  %1330 = vpow2.f32 %v1084_v45  ;;  %vm617_vm0 = vweird.f32 %v1329_v47  ;;  %v604_v8 = vsel %vm603_vm5, %v1865_v32, %v600_v30  ;;  %v499_v27 = vpop.f32.mrf.mxu1 }
 0x136   : > { %1332 = vrcp.f32 %v1884_v51  ;;  %vm618_vm4 = vmor %vm616_vm3, %vm617_vm0  ;;  %v609_v16 = vsel %vm606_vm7, %v608_v12, %v604_v8  ;;  %vm631_vm9 = vweird.f32 %v1884_v51 }
 0x137   : > { %v613_v54 = vsub.f32 1.0, %v612_v50  ;;  %v660_v20 = vmul.f32 %v609_v16, %v1824_v46  ;;  %v635_v46 = vand.u32 2147483647, %v1884_v51 }
 0x139   : > { %v614_v56 = vmul.f32 %v1329_v47, %v613_v54  ;;  %v668_v25 = vmul.f32 %v660_v20, %v494_v57  ;;  %vm636_vm15 = vcmp.eq.f32.partialorder %v635_v46, 8.507059e+37 }
 0x13b   : > { %v1331_v58 = vpop.eup %1330  ;;  %v615_v63 = vadd.f32 %v1329_v47, %v614_v56 }
 0x13c   : > { %v535_v62 = vadd.f32 1.0, %v1331_v58  ;;  %v1333_v3 = vpop.eup %1332 }
 0x13d   : > { %v619_v6 = vsel %vm618_vm4, %v1329_v47, %v615_v63  ;;  %v627_v10 = vmul.f32 %v1333_v3, %v1884_v51  ;;  %vm632_vm10 = vweird.f32 %v1333_v3  ;;  %v501_v41 = vpop.f32.mrf.mxu1 }
 0x13e   : > { %1334 = vrcp.f32 %v535_v62  ;;  %v624_v13 = vsel %vm621_vm6, %v623_v7, %v619_v6  ;;  %v652_v26 = vand.u32 2147483648, %v535_v62  ;;  %vm646_vm11 = vweird.f32 %v535_v62  ;;  %vm633_vm13 = vmor %vm631_vm9, %vm632_vm10 }
 0x13f   : > { %753 = vmatmul.bf16.gmra.mxu2 %v673_v2  ;;  %v661_v17 = vmul.f32 %v624_v13, %v1836_v60  ;;  %v628_v18 = vsub.f32 1.0, %v627_v10  ;;  %v650_v29 = vand.u32 2147483647, %v535_v62  ;;  %v637_v60 = vand.u32 2147483648, %v1884_v51 }
 0x140   : > { %v653_v33 = vor.u32 1.1754944e-38, %v652_v26 }
 0x141   : > { %v629_v22 = vmul.f32 %v1333_v3, %v628_v18  ;;  %v669_v23 = vmul.f32 %v661_v17, %v496_v14  ;;  %vm651_vm14 = vcmp.eq.f32.partialorder %v650_v29, 8.507059e+37  ;;  %v638_v35 = vor.u32 1.1754944e-38, %v637_v60 }
 0x143   : > { %v630_v28 = vadd.f32 %v1333_v3, %v629_v22  ;;  %v674_v31 = vpack.c.bf16 %v669_v23, %v668_v25 }
 0x144   : > { %v1335_v11 = vpop.eup %1334 }
 0x145   : > { %v642_v15 = vmul.f32 %v1335_v11, %v535_v62  ;;  %vm647_vm8 = vweird.f32 %v1335_v11  ;;  %v634_v34 = vsel %vm633_vm13, %v1333_v3, %v630_v28 }
 0x146   : > { %vm648_vm12 = vmor %vm646_vm11, %vm647_vm8  ;;  %v639_v38 = vsel %vm636_vm15, %v638_v35, %v634_v34 }
 0x147   : > { %v643_v9 = vsub.f32 1.0, %v642_v15  ;;  %v662_v43 = vmul.f32 %v639_v38, %v1851_v19 }
 0x149   : > { %v644_v21 = vmul.f32 %v1335_v11, %v643_v9  ;;  %v670_v45 = vmul.f32 %v662_v43, %v499_v27 }
 0x14b   : > { %v645_v24 = vadd.f32 %v1335_v11, %v644_v21 }
 0x14d   : > { %v649_v32 = vsel %vm648_vm12, %v1335_v11, %v645_v24 }
 0x14e   : > { %v654_v37 = vsel %vm651_vm14, %v653_v33, %v649_v32 }
 0x14f   : > { %758 = vmatmul.bf16.gmra.mxu2 %v674_v31  ;;  %v663_v39 = vmul.f32 %v654_v37, %v1877_v40 }
 0x151   : > { %v671_v44 = vmul.f32 %v663_v39, %v501_v41 }
 0x153   : > { %v675_v47 = vpack.c.bf16 %v671_v44, %v670_v45 }
 0x15f   : > { %763 = vmatmul.bf16.gmra.mxu2 %v675_v47 }
 0x1b2   : > { %v749_v48 = vpop.f32.mrf.mxu2 }
 0x1ba   : > { %v751_v49 = vpop.f32.mrf.mxu2 }
 0x1c2   : > { %v754_v50 = vpop.f32.mrf.mxu2 }
 0x1ca   : > { %v756_v42 = vpop.f32.mrf.mxu2 }
 0x1d2   : > { %v759_v51 = vpop.f32.mrf.mxu2 }
 0x1da   : > { %v761_v52 = vpop.f32.mrf.mxu2 }
 0x1e2   : > { %v764_v53 = vpop.f32.mrf.mxu2 }
 0x1e6   : > { %772 = sbr.rel (%p1117_p7) target bundleno = 499 (0x1f3), region = 48 }
 0x1ea   : > { %v766_v54 = vpop.f32.mrf.mxu2 }
 0x1eb   : > { %773 = vst [vmem:[#allocation2 + $0x30] sm:$0xff] %v749_v48 }
 0x1ec   : > { %774 = vst [vmem:[#allocation2] sm:$0xff] %v751_v49 }
 0x1ed   : > { %775 = vst [vmem:[#allocation2 + $0x18] sm:$0xff] %v754_v50 }
 0x1ee   : > { %776 = vst [vmem:[#allocation2 + $0x10] sm:$0xff] %v756_v42 }
 0x1ef   : > { %777 = vst [vmem:[#allocation2 + $0x8] sm:$0xff] %v759_v51 }
 0x1f0   : > { %778 = vst [vmem:[#allocation2 + $0x20] sm:$0xff] %v761_v52 }
 0x1f1   : > { %779 = vst [vmem:[#allocation2 + $0x28] sm:$0xff] %v764_v53 }
 0x1f2   : > { %780 = vst [vmem:[#allocation2 + $0x38] sm:$0xff] %v766_v54 }
 0x1f3 PF: > { %s2027_s10 = sld [smem:[#allocation16_spill]] }
 0x1f9   : > { %p1118_p9 = scmp.le.s32.totalorder %s2027_s10, 0 }
 0x1fb   : > { %784 = sbr.rel (%p1118_p9) target bundleno = 523 (0x20b), region = 52 }
 0x200   : > { %v785_v19 = vld [vmem:[#allocation2 + $0x30] sm:$0xff]  ;;  %v786_v40 = vld [vmem:[#allocation2] sm:$0xff]  ;;  %v787_v55 = vld [vmem:[#allocation2 + $0x18] sm:$0xff] }
 0x201   : > { %v793_v56 = vadd.f32 %v785_v19, %v749_v48  ;;  %v794_v57 = vadd.f32 %v786_v40, %v751_v49  ;;  %v795_v58 = vadd.f32 %v787_v55, %v754_v50  ;;  %v788_v59 = vld [vmem:[#allocation2 + $0x10] sm:$0xff]  ;;  %v789_v61 = vld [vmem:[#allocation2 + $0x8] sm:$0xff]  ;;  %v790_v62 = vld [vmem:[#allocation2 + $0x20] sm:$0xff] }
 0x202   : > { %v796_v63 = vadd.f32 %v788_v59, %v756_v42  ;;  %v791_v0 = vld [vmem:[#allocation2 + $0x28] sm:$0xff]  ;;  %v797_v36 = vadd.f32 %v789_v61, %v759_v51  ;;  %v792_v30 = vld [vmem:[#allocation2 + $0x38] sm:$0xff]  ;;  %v798_v1 = vadd.f32 %v790_v62, %v761_v52 }
 0x203   : > { %801 = vst [vmem:[#allocation2 + $0x30] sm:$0xff] %v793_v56  ;;  %v799_v2 = vadd.f32 %v791_v0, %v764_v53  ;;  %v800_v3 = vadd.f32 %v792_v30, %v766_v54 }
 0x204   : > { %802 = vst [vmem:[#allocation2] sm:$0xff] %v794_v57 }
 0x205   : > { %803 = vst [vmem:[#allocation2 + $0x18] sm:$0xff] %v795_v58 }
 0x206   : > { %804 = vst [vmem:[#allocation2 + $0x10] sm:$0xff] %v796_v63 }
 0x207   : > { %805 = vst [vmem:[#allocation2 + $0x8] sm:$0xff] %v797_v36 }
 0x208   : > { %806 = vst [vmem:[#allocation2 + $0x20] sm:$0xff] %v798_v1 }
 0x209   : > { %807 = vst [vmem:[#allocation2 + $0x28] sm:$0xff] %v799_v2 }
 0x20a   : > { %808 = vst [vmem:[#allocation2 + $0x38] sm:$0xff] %v800_v3 }
 0x20b PF: > { %s2028_s4 = sld [smem:[#allocation16_spill]] }
 0x211   : > { %p1119_p12 = scmp.ne.s32.totalorder %s2028_s4, 1 }
 0x213   : > { %812 = sbr.rel (%p1119_p12) target bundleno = 543 (0x21f), region = 56 }
 0x218   : > { %v813_v4 = vld [vmem:[#allocation2 + $0x30] sm:$0xff]  ;;  %v814_v5 = vld [vmem:[#allocation2] sm:$0xff]  ;;  %v815_v6 = vld [vmem:[#allocation2 + $0x18] sm:$0xff] }
 0x219   : > { %v1159_v7 = vpack.c.bf16 %v814_v5, %v813_v4  ;;  %v816_v8 = vld [vmem:[#allocation2 + $0x10] sm:$0xff]  ;;  %v817_v10 = vld [vmem:[#allocation2 + $0x8] sm:$0xff]  ;;  %v818_v11 = vld [vmem:[#allocation2 + $0x20] sm:$0xff] }
 0x21a   : > { %v1164_v12 = vpack.c.bf16 %v816_v8, %v815_v6  ;;  %v1169_v13 = vpack.c.bf16 %v818_v11, %v817_v10  ;;  %v819_v14 = vld [vmem:[#allocation2 + $0x28] sm:$0xff]  ;;  %v820_v15 = vld [vmem:[#allocation2 + $0x38] sm:$0xff] }
 0x21b   : > { %1160 = vst [vmem:[%s1910_s8] sm:$0xff] %v1159_v7   ;;  %v1174_v16 = vpack.c.bf16 %v820_v15, %v819_v14 }
 0x21c   : > { %1176 = vst [vmem:[%s1910_s8 + $0x8] sm:$0xff] %v1164_v12  }
 0x21d   : > { %1177 = vst [vmem:[%s1910_s8 + $0x10] sm:$0xff] %v1169_v13  }
 0x21e   : > { %1178 = vst [vmem:[%s1910_s8 + $0x18] sm:$0xff] %v1174_v16  }
 0x21f PF: > { %s2029_s11 = sld [smem:[#allocation17_spill]]  ;;  %s850_s1 = sshll.u32 %s1910_s8, 4  ;;  %s851_s1 = int_to_ptr.vmem [resolvable:$true] %s850_s1 }
 0x220   : > { %s2031_s5 = sld [smem:[#allocation27_spill]]  ;;  %s838_s14 = scalar_lea.sflag [#allocation5], %s1763_s15 }
 0x225   : > { %s1155_s27 = sshll.u32 %s2029_s11, 5 }
 0x226   : > { %s849_s7 = scalar_lea.hbm %s2031_s5, %s1155_s27  ;;  %s1446_s21 = scalar_lea.hbm %s2031_s5, 64 }
 0x227   : > { %s852_s3 = sshll.u32 %s849_s7, 4  ;;  %s853_s3 = int_to_ptr.hbm [resolvable:$true] %s852_s3 }
 0x228   : > { %s1440_s17 = sshra.s32 %s853_s3, 4  ;;  %s1441_s17 = int_to_ptr.hbm [resolvable:$true] %s1440_s17 }
 0x229   : > { %s1442_s30 = scalar_lea.hbm %s1441_s17, 32  ;;  %p1447_p6 = scmp.lt.s32.totalorder %s1441_s17, %s2031_s5 }
 0x22a   : > { %p1443_p3 = scmp.ne.s32.totalorder %s1441_s17, %s1442_s30  ;;  %p1448_p10 = scmp.lt.s32.totalorder %s1446_s21, %s1442_s30 }
 0x22c   : > { %p1444_p4 = pnand %p1443_p3, %p1724_p0  ;;  %p1449_p1 = por %p1448_p10, %p1447_p6 }
 0x22e   : > { %p1445_p5 = pneg %p1444_p4 }
 0x230   : > { %p1450_p11 = pnand %p1449_p1, %p1445_p5 }
 0x232   : > { %1453 = shalt.err (!%p1450_p11)
}
 0x233   : > { %s1557_s15 = smov 64   ;;  %s1558_s6 = smov 4  }
 0x234   : > { %1193 = dma.vmem_to_hbm [thread:$0]  (%p1724_p0), %s851_s1, 512, %s853_s3, %s838_s14, %s1557_s15, %s1557_s15, %s1558_s6  }
 0x235 PF: > { %s2032_s23 = sld [smem:[#allocation14_spill]]  ;;  %p1210_p2 = scmp.ge.s32.totalorder %s1552_s22, 2 }
 0x237   : > { %p1206_p13 = pnand %p1210_p2, %p1731_p8 }
 0x239   : > { %p1207_p7 = pneg %p1206_p13 }
 0x23b   : > { %s867_s8 = sand.u32 1, %s2032_s23  }
 0x23c   : > { %s868_s28 = scalar_lea.sflag [#allocation5], %s867_s8 }
 0x23d   : > { %1507 = dma.done.wait (%p1207_p7), %s868_s28, 512  }
 0x23e   : > { %1509 = vsyncadd (%p1207_p7), %s868_s28, 4294966784  ;;  %s22_s22 = sadd.s32 1, %s1552_s22   ;;  %s2034_s10 = sld [smem:[#allocation13_spill]] }
 0x23f   : > { %p19_p9 = scmp.ge.s32.totalorder %s22_s22, 6   ;;  %s2035_s14 = sld [smem:[#allocation20_spill]] }
 0x240   : > { %s2036_s4 = sld [smem:[#allocation15_spill]]  ;;  %s2041_s12 = smov %s1516_s13 }
 0x241   : > { %s2037_s17 = sld [smem:[#allocation25_spill]]  ;;  %s2043_s15 = smov %s1528_s16 }
 0x242   : > { %s2038_s19 = sld [smem:[#allocation18_spill]]  ;;  %s2045_s18 = smov %s1544_s20 }
 0x243   : > { %s2039_s11 = sld [smem:[#allocation19_spill]] }
 0x244   : > { %s2040_s21 = sld [smem:[#allocation22_spill]]  ;;  %s2042_s13 = smov %s2034_s10 }
 0x245   :  { %21 = sbr.rel (!%p19_p9) target bundleno = 14 (0xe), region = 113 }
 0x246   : > { %s2044_s16 = smov %s2036_s4 }
 0x249   : > { %s2046_s20 = smov %s2039_s11 }
 0x24a   :  { %874 = vsyncpa [#allocation4], 1 }
 0x24b   :  { %876 = vsyncpa [#allocation4 + $0x1], 1 }
 0x24c   :  { %877 = vsyncpa [#allocation7], 1 }
 0x24d   :  { %879 = vsyncpa [#allocation7 + $0x1], 1 }
 0x24e   :  { %880 = vsyncpa [#allocation5], 1 }
 0x24f   :  { %882 = vsyncpa [#allocation5 + $0x1], 1 }

</bundles_post_ra>
